<compile_context>
chip_gen: v5e
topology: v5e:2x2
jax: 0.10.0
libtpu: 0.0.40
codegen_flags: <defaults>
</compile_context>

<pallas_src>
import functools

import jax
import jax.numpy as jnp
from jax import lax
from jax.experimental import pallas as pl
from jax.experimental.pallas import tpu as pltpu


def _logreg_kernel(x_ref, w_ref, b_ref, o_ref):
    # x_ref: (block_b, D) input tile (VMEM)
    # w_ref: (1, D)       weight row (VMEM, same block every grid step)
    # b_ref: (1, 1)       bias (SMEM)
    # o_ref: (1, block_b) lane-dense output tile (VMEM)
    x = x_ref[...]
    w = w_ref[...]
    # (1, D) contracted with (block_b, D) over D -> (1, block_b), i.e. w @ x^T.
    z = lax.dot_general(
        w, x,
        dimension_numbers=(((1,), (1,)), ((), ())),
        preferred_element_type=jnp.float32,
    )
    z = z + b_ref[0, 0]
    # Numerically stable sigmoid: exp() only ever sees a non-positive argument.
    pos = z >= 0.0
    e = jnp.exp(jnp.where(pos, -z, z))
    y = jnp.where(pos, 1.0 / (1.0 + e), e / (1.0 + e))
    o_ref[...] = y.astype(o_ref.dtype)


def _round_up(x, m):
    return ((x + m - 1) // m) * m


def _choose_block_b(batch, input_size, itemsize):
    """Pick the number of batch rows processed per grid step."""
    if batch <= 1024:
        # Small problem: single grid step over the whole batch.  (At toy sizes
        # an XLA-fused matvec would beat any standalone kernel anyway.)
        return batch
    # HBM-bound kernel: make the x tile as large as safely fits.  Keep the
    # double-buffered x tile (2 * block_b * D * itemsize) within ~8 MiB so it
    # fits the default scoped-VMEM limit on v5e (16 MiB), v6e and v7x (32 MiB)
    # without touching vmem_limit_bytes.
    x_tile_budget = 8 * 1024 * 1024
    rows = x_tile_budget // (2 * input_size * itemsize)
    rows = max(128, min(int(rows), 4096))
    rows = (rows // 128) * 128                       # lane-dense output blocks
    # Guarantee >= 2 grid steps so v7x's two TensorCores both get work.
    rows = min(rows, _round_up(pl.cdiv(batch, 2), 128))
    return max(rows, 128)


@functools.partial(jax.jit, static_argnames=("block_b",))
def logistic_regression(x, weight, bias, *, block_b=None):
    """Forward pass of the PyTorch LogisticRegression module.

    x:      (B, D) input batch.
    weight: (1, D) nn.Linear weight (out_features=1, in_features=D).
    bias:   (1,)   nn.Linear bias.
    Returns (B, 1) = sigmoid(x @ weight.T + bias).
    """
    B, D = x.shape
    weight = weight.reshape(1, D)
    bias_smem = bias.reshape(1, 1).astype(jnp.float32)

    if block_b is None:
        block_b = _choose_block_b(B, D, x.dtype.itemsize)
    block_b = min(block_b, B)
    grid = (pl.cdiv(B, block_b),)

    # TODO(synk): for very wide input_size, add a second ("arbitrary") K grid
    # axis with an f32 scratch accumulator instead of loading the full
    # (block_b, D) row strip each step.

    out_row = pl.pallas_call(
        _logreg_kernel,
        out_shape=jax.ShapeDtypeStruct((1, B), x.dtype),
        grid_spec=pltpu.PrefetchScalarGridSpec(
            num_scalar_prefetch=0,
            grid=grid,
            in_specs=[
                pl.BlockSpec((block_b, D), lambda i: (i, 0)),   # x tile
                pl.BlockSpec((1, D), lambda i: (0, 0)),         # weight row
                pl.BlockSpec(memory_space=pltpu.SMEM),          # bias scalar
            ],
            out_specs=pl.BlockSpec((1, block_b), lambda i: (0, i)),
        ),
        compiler_params=pltpu.CompilerParams(
            dimension_semantics=("parallel",),
        ),
    )(x, weight, bias_smem)

    return out_row.reshape(B, 1)


if __name__ == "__main__":
    key = jax.random.PRNGKey(0)
    kx, kw, kb, kx2 = jax.random.split(key, 4)

    # Small demo consistent with the module: batch=8, input_size=32.
    batch, input_size = 8, 32
    bound = 1.0 / (input_size ** 0.5)   # nn.Linear default init range
    weight = jax.random.uniform(kw, (1, input_size), jnp.float32, -bound, bound)
    bias = jax.random.uniform(kb, (1,), jnp.float32, -bound, bound)
    x = jax.random.normal(kx, (batch, input_size), jnp.float32)

    out = jax.block_until_ready(logistic_regression(x, weight, bias))
    ref = jax.nn.sigmoid(
        jnp.dot(x, weight.T, precision=jax.lax.Precision.HIGHEST) + bias
    )
    assert out.shape == (batch, 1)
    # atol allows for the MXU's default-precision f32 handling inside the
    # kernel vs. the HIGHEST-precision reference.
    assert jnp.allclose(out, ref, atol=5e-3, rtol=0.0)

    # Exercise the tiled, lane-dense multi-block path on a larger batch.
    B2, D2 = 2048, 256
    bound2 = 1.0 / (D2 ** 0.5)
    w2 = jax.random.uniform(kw, (1, D2), jnp.float32, -bound2, bound2)
    b2 = jax.random.uniform(kb, (1,), jnp.float32, -bound2, bound2)
    x2 = jax.random.normal(kx2, (B2, D2), jnp.float32)
    out2 = jax.block_until_ready(logistic_regression(x2, w2, b2))
    ref2 = jax.nn.sigmoid(
        jnp.dot(x2, w2.T, precision=jax.lax.Precision.HIGHEST) + b2
    )
    assert out2.shape == (B2, 1)
    assert jnp.allclose(out2, ref2, atol=5e-3, rtol=0.0)

    print("KERNEL_OK")
</pallas_src>

<mosaic_0001>
module attributes {stable_mosaic.version = 11 : i64} {
  func.func @_logreg_kernel(%arg0: i32, %arg1: memref<8x32xf32, #tpu.memory_space<vmem>>, %arg2: memref<1x32xf32, #tpu.memory_space<vmem>>, %arg3: memref<1x1xf32, #tpu.memory_space<smem>>, %arg4: memref<1x8xf32, #tpu.memory_space<vmem>>) attributes {dimension_semantics = [#tpu.dimension_semantics<parallel>], iteration_bounds = array<i64: 1>, scalar_prefetch = 0 : i64, scratch_operands = 0 : i64, tpu.core_type = #tpu.core_type<tc>, window_params = [{transform_indices = @transform_0, window_bounds = array<i64: 8, 32>}, {pipeline_mode = #tpu.pipeline_mode<synchronous>, transform_indices = @transform_1, window_bounds = array<i64: 1, 32>}, {transform_indices = @transform_2, window_bounds = array<i64: 1, 1>}, {transform_indices = @transform_3, window_bounds = array<i64: 1, 8>}]} {
    %c0 = arith.constant 0 : index
    %c0_0 = arith.constant 0 : index
    %0 = vector.load %arg1[%c0, %c0_0] : memref<8x32xf32, #tpu.memory_space<vmem>>, vector<8x32xf32>
    %c0_1 = arith.constant 0 : index
    %c0_2 = arith.constant 0 : index
    %1 = vector.load %arg2[%c0_1, %c0_2] : memref<1x32xf32, #tpu.memory_space<vmem>>, vector<1x32xf32>
    %cst = arith.constant dense<0.000000e+00> : vector<1x8xf32>
    %2 = tpu.matmul %1, %0, %cst {dimension_numbers = #tpu.dot_dimension_numbers<[1], [1], [0], [0], [0, 0, 1, 0], [], []>} : vector<1x32xf32>, vector<8x32xf32>, vector<1x8xf32> -> vector<1x8xf32>
    %c0_3 = arith.constant 0 : index
    %c0_4 = arith.constant 0 : index
    %3 = memref.load %arg3[%c0_3, %c0_4] : memref<1x1xf32, #tpu.memory_space<smem>>
    %4 = vector.broadcast %3 : f32 to vector<1x8xf32>
    %5 = arith.addf %2, %4 : vector<1x8xf32>
    %cst_5 = arith.constant 0.000000e+00 : f32
    %6 = vector.broadcast %cst_5 : f32 to vector<1x8xf32>
    %7 = arith.cmpf oge, %5, %6 : vector<1x8xf32>
    %cst_6 = arith.constant 0.000000e+00 : f32
    %8 = vector.broadcast %cst_6 : f32 to vector<1x8xf32>
    %9 = arith.subf %8, %5 : vector<1x8xf32>
    %10 = arith.select %7, %9, %5 : vector<1x8xi1>, vector<1x8xf32>
    %11 = math.exp %10 : vector<1x8xf32>
    %cst_7 = arith.constant 1.000000e+00 : f32
    %12 = vector.broadcast %cst_7 : f32 to vector<1x8xf32>
    %13 = arith.addf %12, %11 : vector<1x8xf32>
    %cst_8 = arith.constant 1.000000e+00 : f32
    %14 = vector.broadcast %cst_8 : f32 to vector<1x8xf32>
    %15 = arith.divf %14, %13 : vector<1x8xf32>
    %cst_9 = arith.constant 1.000000e+00 : f32
    %16 = vector.broadcast %cst_9 : f32 to vector<1x8xf32>
    %17 = arith.addf %16, %11 : vector<1x8xf32>
    %18 = arith.divf %11, %17 : vector<1x8xf32>
    %19 = arith.select %7, %15, %18 : vector<1x8xi1>, vector<1x8xf32>
    %c0_10 = arith.constant 0 : index
    %c0_11 = arith.constant 0 : index
    %20 = vector.load %arg4[%c0_10, %c0_11] : memref<1x8xf32, #tpu.memory_space<vmem>>, vector<1x8xf32>
    tpu.vector_store %arg4[%c0_10, %c0_11], %19 {strides = array<i32>} : memref<1x8xf32, #tpu.memory_space<vmem>>, vector<1x8xf32>,
    return
  }
  func.func @transform_0(%arg0: i32) -> (i32, i32) {
    %c0_i32 = arith.constant 0 : i32
    %c0_i32_0 = arith.constant 0 : i32
    return %arg0, %c0_i32 : i32, i32
  }
  func.func @transform_1(%arg0: i32) -> (i32, i32) {
    %c0_i32 = arith.constant 0 : i32
    %c0_i32_0 = arith.constant 0 : i32
    %c0_i32_1 = arith.constant 0 : i32
    return %c0_i32, %c0_i32_0 : i32, i32
  }
  func.func @transform_2(%arg0: i32) -> (i32, i32) {
    %c0_i32 = arith.constant 0 : i32
    %c0_i32_0 = arith.constant 0 : i32
    %c0_i32_1 = arith.constant 0 : i32
    return %c0_i32, %c0_i32_0 : i32, i32
  }
  func.func @transform_3(%arg0: i32) -> (i32, i32) {
    %c0_i32 = arith.constant 0 : i32
    %c0_i32_0 = arith.constant 0 : i32
    return %c0_i32, %arg0 : i32, i32
  }
}

</mosaic_0001>

<bundles_post_ra>
// kernel: logistic_regression.1
= control target key start
LH: loop header
LB: loop body
LE: loop exit
PB: predicated region body
PF: predicated region fallthrough
CT: control target
= control target key end

     0   :  { %9 = vsyncpa [#allocation4], 0  ;;  %s199_s0 = inlined_call_operand.hbm [shape: f32[8,32], index: 0, kind: input, shape index: {}]   ;;  %s200_s1 = inlined_call_operand.vmem [shape: f32[1,32], index: 1, kind: input, shape index: {}]   ;;  %s201_s2 = inlined_call_operand.<no memory space> [shape: f32[1,1], index: 2, kind: input, shape index: {}]   ;;  %s202_s3 = inlined_call_operand.hbm [shape: f32[1,8], index: 3, kind: output, shape index: {}]  }
   0x1   :  { %10 = vsyncpa [#allocation5], 0  ;;  %s16_s14 = sshll.u32 %s199_s0, 4  ;;  %s163_s15 = smov [#allocation3]   ;;  %s17_s14 = int_to_ptr.hbm [resolvable:$true] %s16_s14 }
   0x2   :  { %s18_s16 = sshll.u32 %s163_s15, 4  ;;  %s19_s16 = int_to_ptr.vmem [resolvable:$true] %s18_s16 }
   0x3   :  { %21 = dma.hbm_to_vmem [thread:$0]  %s17_s14, 128, %s19_s16, [#allocation4]  }
   0x4   :  { %159 = dma.done.wait [#allocation4], 128  }
   0x5   :  { %160 = vsyncadd [#allocation4], 4294967168  ;;  %vm34_vm0 = vcmask 261120   ;;  %v30_v0 = vld [vmem:[#allocation3] sm:$0xff]  ;;  %v33_v2 = vstv %s201_s2  ;;  %s164_s0 = smov [#allocation6]   ;;  %s93_s22 = sshll.u32 %s202_s3, 4  ;;  %s94_s22 = int_to_ptr.hbm [resolvable:$true] %s93_s22 }
   0x6   :  { %103 = vmatpush.xpose.msk.msra.mxu0 %vm34_vm0, %v30_v0  ;;  %v31_v1 = vld [vmem:[%s200_s1] sm:$0x1]  ;;  %s91_s1 = sshll.u32 %s164_s0, 4  ;;  %vm84_vm6 = vcmask 57344   ;;  %s92_s1 = int_to_ptr.vmem [resolvable:$true] %s91_s1 }
   0x9   :  { %104 = vmatmul.msk.f32.vlgmr.msra.gmra.mxu0 %vm34_vm0, %v31_v1 }
  0x86   :  { %v58_v3 = vpop.f32.mrf.mxu0 }
  0x87   :  { %v59_v4 = vadd.f32 %v58_v3, %v33_v2 }
  0x89   :  { %vm61_vm1 = vcmp.ge.f32.partialorder %v59_v4, 0.0  ;;  %v62_v5 = vsub.f32 0.0, %v59_v4 }
  0x8b   :  { %v63_v6 = vsel %vm61_vm1, %v62_v5, %v59_v4 }
  0x8c   :  { %v64_v7 = vmul.f32 1.442695, %v63_v6 }
  0x8e   :  { %107 = vpow2.f32 %v64_v7 }
  0x94   :  { %v108_v8 = vpop.eup %107 }
  0x95   :  { %v66_v9 = vadd.f32 1.0, %v108_v8 }
  0x97   :  { %109 = vrcp.f32 %v66_v9  ;;  %v78_v13 = vand.u32 2147483648, %v66_v9  ;;  %v76_v15 = vand.u32 2147483647, %v66_v9  ;;  %vm72_vm3 = vweird.f32 %v66_v9 }
  0x99   :  { %v79_v17 = vor.u32 1.1754944e-38, %v78_v13  ;;  %vm77_vm5 = vcmp.eq.f32.partialorder %v76_v15, 8.507059e+37 }
  0x9d   :  { %v110_v10 = vpop.eup %109 }
  0x9e   :  { %v68_v11 = vmul.f32 %v110_v10, %v66_v9  ;;  %vm73_vm2 = vweird.f32 %v110_v10 }
  0x9f   :  { %vm74_vm4 = vmor %vm72_vm3, %vm73_vm2 }
  0xa0   :  { %v69_v12 = vsub.f32 1.0, %v68_v11 }
  0xa2   :  { %v70_v14 = vmul.f32 %v110_v10, %v69_v12 }
  0xa4   :  { %v71_v16 = vadd.f32 %v110_v10, %v70_v14 }
  0xa6   :  { %v75_v18 = vsel %vm74_vm4, %v110_v10, %v71_v16 }
  0xa7   :  { %v80_v19 = vsel %vm77_vm5, %v79_v17, %v75_v18 }
  0xa8   :  { %v82_v20 = vmul.f32 %v108_v8, %v80_v19 }
  0xaa   :  { %v83_v21 = vsel %vm61_vm1, %v80_v19, %v82_v20 }
  0xab   :  { %85 = vst.msk [vmem:[#allocation6] sm:$0x1] %vm84_vm6, %v83_v21 }
  0xac   :  { %96 = dma.vmem_to_hbm [thread:$0]  %s92_s1, 16, %s94_s22, [#allocation5]  }
  0xad   :  { %161 = dma.done.wait [#allocation5], 16  }
  0xae   :  { %162 = vsyncadd [#allocation5], 4294967280 }
  0xaf   :  { %101 = vsyncpa [#allocation4], 1 }
  0xb0   :  { %102 = vsyncpa [#allocation5], 1 }

</bundles_post_ra>
